<compile_context>
chip_gen: v7x
topology: tpu7x:2x2x1
jax: 0.10.0
libtpu: 0.0.40
codegen_flags: <defaults>
</compile_context>

<pallas_src>
import jax
import jax.numpy as jnp
from jax.experimental import pallas as pl
from jax.experimental.pallas import tpu as pltpu


def _cdiv(a, b):
    return (a + b - 1) // b


def _round_up(n, m):
    return ((n + m - 1) // m) * m


def _round_down(n, m):
    return (n // m) * m


def _pick_tile_n(N, rows_cap, row_align):
    """Batch tile: >=2 grid steps (v7x megacore), MXU-aligned when N is large."""
    target = _cdiv(N, 2)  # guarantee at least 2 batch tiles
    if N >= 512 and rows_cap >= 256:
        # 256-row tiles match the v6e/v7x 256x256 MXU; cap to keep steps cheap.
        tile = min(_round_up(target, 256), _round_down(rows_cap, 256), 1024)
    else:
        tile = min(_round_up(target, row_align),
                   max(row_align, _round_down(rows_cap, row_align)))
    return max(row_align, tile)


# ----------------------------------------------------------------------------
# Standalone FixedScaler kernel: (x - mean) * (1 / scale)
# ----------------------------------------------------------------------------
def fixed_scaler_kernel(x_ref, mean_ref, inv_scale_ref, o_ref):
    # Native-dtype load, cast on the VPU; divide replaced by a reciprocal mul.
    o_ref[...] = (x_ref[...].astype(jnp.float32) - mean_ref[...]) * inv_scale_ref[...]


def fixed_scaler(x, mean, scale, *, budget_bytes=12 * 1024 * 1024):
    """(x - mean) / scale, x: (N, F); mean/scale: (F,). Pure mem-bound kernel."""
    N, F = x.shape
    itemsize = jnp.dtype(x.dtype).itemsize
    mean2d = mean.reshape(1, F).astype(jnp.float32)
    inv2d = (1.0 / scale.astype(jnp.float32)).reshape(1, F)

    # Lane-dense feature tile; ragged last tile is masked by Pallas, so no
    # F % 128 requirement.  Full F when narrow.
    tile_f = 2048 if F > 2048 else F
    # Packed dtypes need more sublanes per block (bf16:16, int8/uint8:32).
    row_align = max(8, 32 // itemsize)
    per_row = 2 * tile_f * itemsize + 2 * tile_f * 4  # double-buffered in + out
    rows_cap = max(row_align, budget_bytes // per_row)
    tile_n = _pick_tile_n(N, rows_cap, row_align)

    grid = (_cdiv(N, tile_n), _cdiv(F, tile_f))
    return pl.pallas_call(
        fixed_scaler_kernel,
        out_shape=jax.ShapeDtypeStruct((N, F), jnp.float32),
        grid_spec=pltpu.PrefetchScalarGridSpec(
            num_scalar_prefetch=0,
            grid=grid,
            in_specs=[
                pl.BlockSpec((tile_n, tile_f), lambda i, j: (i, j)),  # x tile
                pl.BlockSpec((1, tile_f), lambda i, j: (0, j)),       # mean
                pl.BlockSpec((1, tile_f), lambda i, j: (0, j)),       # 1/scale
            ],
            out_specs=pl.BlockSpec((tile_n, tile_f), lambda i, j: (i, j)),
        ),
        compiler_params=pltpu.CompilerParams(
            dimension_semantics=("parallel", "parallel")),
    )(x, mean2d, inv2d)


# ----------------------------------------------------------------------------
# Fused PipelineModel forward:
#   z = (x - pca_mean) @ components.T       (fixed PCA/SPCA transform)
#   s = (z - sc_mean) * (1 / sc_scale)      (fixed scaler, fused in-register)
#   out = relu(s @ W1 + b1) @ W2 + b2       (classifier MLP)
# ----------------------------------------------------------------------------
def pipeline_kernel(x_ref, pca_mean_ref, pca_w_ref, sc_mean_ref, inv_scale_ref,
                    w1_ref, b1_ref, w2_ref, b2_ref, o_ref, z_acc):
    k = pl.program_id(1)  # reduction step over the PCA input dimension D

    @pl.when(k == 0)
    def _():
        z_acc[...] = jnp.zeros_like(z_acc)

    # Centering in f32 on the VPU (v5e has no bf16 VPU); only the MXU operands
    # are cast down to bf16, accumulation stays f32.
    xc = (x_ref[...].astype(jnp.float32) - pca_mean_ref[...]).astype(jnp.bfloat16)
    z_acc[...] += jnp.dot(xc, pca_w_ref[...], preferred_element_type=jnp.float32)

    @pl.when(k == pl.num_programs(1) - 1)
    def _():
        # Fixed scaler, fused in-register (no HBM round trip for z / s / h).
        s = (z_acc[...] - sc_mean_ref[...]) * inv_scale_ref[...]
        h = jnp.maximum(
            jnp.dot(s.astype(jnp.bfloat16), w1_ref[...],
                    preferred_element_type=jnp.float32) + b1_ref[...], 0.0)
        o_ref[...] = (jnp.dot(h.astype(jnp.bfloat16), w2_ref[...],
                              preferred_element_type=jnp.float32)
                      + b2_ref[...]).astype(o_ref.dtype)


def prepare_pipeline_params(pca_mean, pca_components, sc_mean, sc_scale,
                            w1, b1, w2, b2):
    """One-time weight prep (transpose / reciprocal / reshape / bf16 cast),
    hoisted out of the per-call forward so it never reruns per inference."""
    f32, bf16 = jnp.float32, jnp.bfloat16
    K, D = pca_components.shape
    H = w1.shape[1]
    C = w2.shape[1]
    return {
        "pca_mean": pca_mean.reshape(1, D).astype(f32),
        "pca_w": pca_components.astype(f32).T.astype(bf16),        # (D, K) bf16
        "sc_mean": sc_mean.reshape(1, K).astype(f32),
        "inv_scale": (1.0 / sc_scale.astype(f32)).reshape(1, K),
        "w1": w1.astype(bf16),
        "b1": b1.reshape(1, H).astype(f32),
        "w2": w2.astype(bf16),
        "b2": b2.reshape(1, C).astype(f32),
    }


def pipeline_forward(x, params, *, budget_bytes=12 * 1024 * 1024):
    """Full PipelineModel forward in one fused Pallas kernel.

    x: (N, D) flattened images in their native dtype; params from
    prepare_pipeline_params().  Grid = (batch tiles, D reduction tiles).
    """
    # TODO(synk): arbitrary classifier submodules (conv nets, deeper MLPs) are
    # not covered; this fuses the canonical Linear->ReLU->Linear classifier.
    N, D = x.shape
    K = params["pca_w"].shape[1]
    H = params["w1"].shape[1]
    C = params["w2"].shape[1]
    itemsize = jnp.dtype(x.dtype).itemsize

    # Reduction tile over D: full D when small, else 2048 (multiple of 128/16)
    # so the (tile_d, K) bf16 weight block stays bounded on v7x's 64 MiB VMEM.
    tile_d = D if D <= 2048 else 2048
    row_align = max(8, 32 // itemsize)  # packed input dtypes need more sublanes

    # VMEM working set: constant-index blocks are still double-buffered by the
    # default pipeline, so count the bf16 weight mats + f32 vectors twice; add
    # the z accumulator scratch and in-flight s/h temporaries per row.
    weight_bytes = 2 * (tile_d * K * 2 + K * H * 2 + H * C * 2
                        + (tile_d + 2 * K + H + C) * 4)
    per_row = (2 * tile_d * itemsize      # x block (double-buffered)
               + 2 * C * 4                # out block (double-buffered)
               + K * 4                    # z accumulator scratch
               + 2 * (K + H) * 4)         # s / h temporaries (allowance)
    rows_cap = max(row_align, (budget_bytes - weight_bytes) // per_row)
    tile_n = _pick_tile_n(N, rows_cap, row_align)

    grid = (_cdiv(N, tile_n), _cdiv(D, tile_d))
    return pl.pallas_call(
        pipeline_kernel,
        out_shape=jax.ShapeDtypeStruct((N, C), jnp.float32),
        grid_spec=pltpu.PrefetchScalarGridSpec(
            num_scalar_prefetch=0,
            grid=grid,
            in_specs=[
                pl.BlockSpec((tile_n, tile_d), lambda i, k: (i, k)),  # x tile
                pl.BlockSpec((1, tile_d), lambda i, k: (0, k)),       # pca mean
                pl.BlockSpec((tile_d, K), lambda i, k: (k, 0)),       # components^T (bf16)
                pl.BlockSpec((1, K), lambda i, k: (0, 0)),            # scaler mean
                pl.BlockSpec((1, K), lambda i, k: (0, 0)),            # scaler 1/scale
                pl.BlockSpec((K, H), lambda i, k: (0, 0)),            # classifier W1 (bf16)
                pl.BlockSpec((1, H), lambda i, k: (0, 0)),            # classifier b1
                pl.BlockSpec((H, C), lambda i, k: (0, 0)),            # classifier W2 (bf16)
                pl.BlockSpec((1, C), lambda i, k: (0, 0)),            # classifier b2
            ],
            out_specs=pl.BlockSpec((tile_n, C), lambda i, k: (i, 0)),
            scratch_shapes=[pltpu.VMEM((tile_n, K), jnp.float32)],    # z accumulator
        ),
        compiler_params=pltpu.CompilerParams(
            dimension_semantics=("parallel", "arbitrary")),
    )(x, params["pca_mean"], params["pca_w"], params["sc_mean"],
      params["inv_scale"], params["w1"], params["b1"], params["w2"],
      params["b2"])


if __name__ == "__main__":
    key = jax.random.PRNGKey(0)
    ks = jax.random.split(key, 9)

    # Small shapes: 16 flattened 16x16 images -> 128 PCA comps -> 128 hidden -> 10 classes.
    N, D, K, H, C = 16, 256, 128, 128, 10
    x = jax.random.normal(ks[0], (N, D), dtype=jnp.float32)
    pca_mean = jax.random.normal(ks[1], (D,), dtype=jnp.float32) * 0.1
    pca_components = jax.random.normal(ks[2], (K, D), dtype=jnp.float32) / jnp.sqrt(D)
    sc_mean = jax.random.normal(ks[3], (K,), dtype=jnp.float32) * 0.1
    sc_scale = jax.random.uniform(ks[4], (K,), dtype=jnp.float32, minval=0.5, maxval=2.0)
    w1 = jax.random.normal(ks[5], (K, H), dtype=jnp.float32) / jnp.sqrt(K)
    b1 = jax.random.normal(ks[6], (H,), dtype=jnp.float32) * 0.01
    w2 = jax.random.normal(ks[7], (H, C), dtype=jnp.float32) / jnp.sqrt(H)
    b2 = jax.random.normal(ks[8], (C,), dtype=jnp.float32) * 0.01

    # One-time weight prep, then the fused forward (the module's forward()).
    params = prepare_pipeline_params(pca_mean, pca_components, sc_mean, sc_scale,
                                     w1, b1, w2, b2)
    out = jax.block_until_ready(pipeline_forward(x, params))
    assert out.shape == (N, C)

    # Reference 1: same bf16 MXU-operand rounding, f32 accumulation (tight).
    f32, bf = jnp.float32, jnp.bfloat16
    rt = lambda a: a.astype(bf).astype(f32)
    z_bf = rt(x - pca_mean[None, :]) @ rt(pca_components.T)
    s_bf = (z_bf - sc_mean[None, :]) / sc_scale[None, :]
    h_bf = jnp.maximum(rt(s_bf) @ rt(w1) + b1[None, :], 0.0)
    ref_bf = rt(h_bf) @ rt(w2) + b2[None, :]
    assert jnp.allclose(out, ref_bf, atol=1e-2, rtol=1e-2), \
        float(jnp.max(jnp.abs(out - ref_bf)))

    # Reference 2: pure f32 pipeline (loose — validates overall semantics with
    # headroom for the bf16 MXU inputs).
    z_ref = (x - pca_mean[None, :]) @ pca_components.T
    s_ref = (z_ref - sc_mean[None, :]) / sc_scale[None, :]
    h_ref = jnp.maximum(s_ref @ w1 + b1[None, :], 0.0)
    ref = h_ref @ w2 + b2[None, :]
    assert jnp.allclose(out, ref, atol=1e-1, rtol=1e-1), \
        float(jnp.max(jnp.abs(out - ref)))

    # Standalone FixedScaler kernel check (pure f32 elementwise path).
    sc_out = jax.block_until_ready(fixed_scaler(z_ref, sc_mean, sc_scale))
    assert jnp.allclose(sc_out, s_ref, atol=1e-5, rtol=1e-5)

    print("KERNEL_OK")
</pallas_src>

<mosaic_0001>
module attributes {stable_mosaic.version = 11 : i64} {
  func.func @pipeline_kernel(%arg0: i32, %arg1: i32, %arg2: memref<8x256xf32, #tpu.memory_space<vmem>>, %arg3: memref<1x256xf32, #tpu.memory_space<vmem>>, %arg4: memref<256x128xbf16, #tpu.memory_space<vmem>>, %arg5: memref<1x128xf32, #tpu.memory_space<vmem>>, %arg6: memref<1x128xf32, #tpu.memory_space<vmem>>, %arg7: memref<128x128xbf16, #tpu.memory_space<vmem>>, %arg8: memref<1x128xf32, #tpu.memory_space<vmem>>, %arg9: memref<128x10xbf16, #tpu.memory_space<vmem>>, %arg10: memref<1x10xf32, #tpu.memory_space<vmem>>, %arg11: memref<8x10xf32, #tpu.memory_space<vmem>>, %arg12: memref<8x128xf32, #tpu.memory_space<vmem>>) attributes {dimension_semantics = [#tpu.dimension_semantics<parallel>, #tpu.dimension_semantics<arbitrary>], iteration_bounds = array<i64: 2, 1>, scalar_prefetch = 0 : i64, scratch_operands = 1 : i64, tpu.core_type = #tpu.core_type<tc>, window_params = [{transform_indices = @transform_0, window_bounds = array<i64: 8, 256>}, {transform_indices = @transform_1, window_bounds = array<i64: 1, 256>}, {transform_indices = @transform_2, window_bounds = array<i64: 256, 128>}, {pipeline_mode = #tpu.pipeline_mode<synchronous>, transform_indices = @transform_3, window_bounds = array<i64: 1, 128>}, {pipeline_mode = #tpu.pipeline_mode<synchronous>, transform_indices = @transform_4, window_bounds = array<i64: 1, 128>}, {pipeline_mode = #tpu.pipeline_mode<synchronous>, transform_indices = @transform_5, window_bounds = array<i64: 128, 128>}, {pipeline_mode = #tpu.pipeline_mode<synchronous>, transform_indices = @transform_6, window_bounds = array<i64: 1, 128>}, {pipeline_mode = #tpu.pipeline_mode<synchronous>, transform_indices = @transform_7, window_bounds = array<i64: 128, 10>}, {pipeline_mode = #tpu.pipeline_mode<synchronous>, transform_indices = @transform_8, window_bounds = array<i64: 1, 10>}, {transform_indices = @transform_9, window_bounds = array<i64: 8, 10>}]} {
    %c0_i32 = arith.constant 0 : i32
    %0 = arith.cmpi eq, %arg1, %c0_i32 : i32
    %1 = arith.extui %0 : i1 to i32
    %c0_i32_0 = arith.constant 0 : i32
    %2 = arith.cmpi ne, %1, %c0_i32_0 : i32
    scf.if %2 {
      %cst_12 = arith.constant 0.000000e+00 : f32
      %16 = vector.broadcast %cst_12 : f32 to vector<8x128xf32>
      %c0_13 = arith.constant 0 : index
      %c0_14 = arith.constant 0 : index
      %17 = vector.load %arg12[%c0_13, %c0_14] : memref<8x128xf32, #tpu.memory_space<vmem>>, vector<8x128xf32>
      tpu.vector_store %arg12[%c0_13, %c0_14], %16 {strides = array<i32>} : memref<8x128xf32, #tpu.memory_space<vmem>>, vector<8x128xf32>,
    } else {
    }
    %c0 = arith.constant 0 : index
    %c0_1 = arith.constant 0 : index
    %3 = vector.load %arg2[%c0, %c0_1] : memref<8x256xf32, #tpu.memory_space<vmem>>, vector<8x256xf32>
    %c0_2 = arith.constant 0 : index
    %c0_3 = arith.constant 0 : index
    %4 = vector.load %arg3[%c0_2, %c0_3] : memref<1x256xf32, #tpu.memory_space<vmem>>, vector<1x256xf32>
    %5 = vector.broadcast %4 : vector<1x256xf32> to vector<8x256xf32>
    %6 = arith.subf %3, %5 : vector<8x256xf32>
    %7 = arith.truncf %6 : vector<8x256xf32> to vector<8x256xbf16>
    %c0_4 = arith.constant 0 : index
    %c0_5 = arith.constant 0 : index
    %8 = vector.load %arg12[%c0_4, %c0_5] : memref<8x128xf32, #tpu.memory_space<vmem>>, vector<8x128xf32>
    %c0_6 = arith.constant 0 : index
    %c0_7 = arith.constant 0 : index
    %9 = vector.load %arg4[%c0_6, %c0_7] : memref<256x128xbf16, #tpu.memory_space<vmem>>, vector<256x128xbf16>
    %cst = arith.constant dense<0.000000e+00> : vector<8x128xf32>
    %10 = tpu.matmul %7, %9, %cst {dimension_numbers = #tpu.dot_dimension_numbers<[1], [0], [0], [1], [0, 0, 1, 1], [], []>} : vector<8x256xbf16>, vector<256x128xbf16>, vector<8x128xf32> -> vector<8x128xf32>
    %11 = arith.addf %8, %10 : vector<8x128xf32>
    %c0_8 = arith.constant 0 : index
    %c0_9 = arith.constant 0 : index
    %12 = vector.load %arg12[%c0_8, %c0_9] : memref<8x128xf32, #tpu.memory_space<vmem>>, vector<8x128xf32>
    tpu.vector_store %arg12[%c0_8, %c0_9], %11 {strides = array<i32>} : memref<8x128xf32, #tpu.memory_space<vmem>>, vector<8x128xf32>,
    %c0_i32_10 = arith.constant 0 : i32
    %13 = arith.cmpi eq, %arg1, %c0_i32_10 : i32
    %14 = arith.extui %13 : i1 to i32
    %c0_i32_11 = arith.constant 0 : i32
    %15 = arith.cmpi ne, %14, %c0_i32_11 : i32
    scf.if %15 {
      %c0_12 = arith.constant 0 : index
      %c0_13 = arith.constant 0 : index
      %16 = vector.load %arg12[%c0_12, %c0_13] : memref<8x128xf32, #tpu.memory_space<vmem>>, vector<8x128xf32>
      %c0_14 = arith.constant 0 : index
      %c0_15 = arith.constant 0 : index
      %17 = vector.load %arg5[%c0_14, %c0_15] : memref<1x128xf32, #tpu.memory_space<vmem>>, vector<1x128xf32>
      %18 = vector.broadcast %17 : vector<1x128xf32> to vector<8x128xf32>
      %19 = arith.subf %16, %18 : vector<8x128xf32>
      %c0_16 = arith.constant 0 : index
      %c0_17 = arith.constant 0 : index
      %20 = vector.load %arg6[%c0_16, %c0_17] : memref<1x128xf32, #tpu.memory_space<vmem>>, vector<1x128xf32>
      %21 = vector.broadcast %20 : vector<1x128xf32> to vector<8x128xf32>
      %22 = arith.mulf %19, %21 : vector<8x128xf32>
      %23 = arith.truncf %22 : vector<8x128xf32> to vector<8x128xbf16>
      %c0_18 = arith.constant 0 : index
      %c0_19 = arith.constant 0 : index
      %24 = vector.load %arg7[%c0_18, %c0_19] : memref<128x128xbf16, #tpu.memory_space<vmem>>, vector<128x128xbf16>
      %cst_20 = arith.constant dense<0.000000e+00> : vector<8x128xf32>
      %25 = tpu.matmul %23, %24, %cst_20 {dimension_numbers = #tpu.dot_dimension_numbers<[1], [0], [0], [1], [0, 0, 1, 1], [], []>} : vector<8x128xbf16>, vector<128x128xbf16>, vector<8x128xf32> -> vector<8x128xf32>
      %c0_21 = arith.constant 0 : index
      %c0_22 = arith.constant 0 : index
      %26 = vector.load %arg8[%c0_21, %c0_22] : memref<1x128xf32, #tpu.memory_space<vmem>>, vector<1x128xf32>
      %27 = vector.broadcast %26 : vector<1x128xf32> to vector<8x128xf32>
      %28 = arith.addf %25, %27 : vector<8x128xf32>
      %cst_23 = arith.constant 0.000000e+00 : f32
      %29 = vector.broadcast %cst_23 : f32 to vector<8x128xf32>
      %30 = arith.maximumf %28, %29 : vector<8x128xf32>
      %31 = arith.truncf %30 : vector<8x128xf32> to vector<8x128xbf16>
      %c0_24 = arith.constant 0 : index
      %c0_25 = arith.constant 0 : index
      %32 = vector.load %arg9[%c0_24, %c0_25] : memref<128x10xbf16, #tpu.memory_space<vmem>>, vector<128x10xbf16>
      %cst_26 = arith.constant dense<0.000000e+00> : vector<8x10xf32>
      %33 = tpu.matmul %31, %32, %cst_26 {dimension_numbers = #tpu.dot_dimension_numbers<[1], [0], [0], [1], [0, 0, 1, 1], [], []>} : vector<8x128xbf16>, vector<128x10xbf16>, vector<8x10xf32> -> vector<8x10xf32>
      %c0_27 = arith.constant 0 : index
      %c0_28 = arith.constant 0 : index
      %34 = vector.load %arg10[%c0_27, %c0_28] : memref<1x10xf32, #tpu.memory_space<vmem>>, vector<1x10xf32>
      %35 = vector.broadcast %34 : vector<1x10xf32> to vector<8x10xf32>
      %36 = arith.addf %33, %35 : vector<8x10xf32>
      %c0_29 = arith.constant 0 : index
      %c0_30 = arith.constant 0 : index
      %37 = vector.load %arg11[%c0_29, %c0_30] : memref<8x10xf32, #tpu.memory_space<vmem>>, vector<8x10xf32>
      tpu.vector_store %arg11[%c0_29, %c0_30], %36 {strides = array<i32>} : memref<8x10xf32, #tpu.memory_space<vmem>>, vector<8x10xf32>,
    } else {
    }
    return
  }
  func.func @transform_0(%arg0: i32, %arg1: i32) -> (i32, i32) {
    %c0_i32 = arith.constant 0 : i32
    return %arg0, %arg1 : i32, i32
  }
  func.func @transform_1(%arg0: i32, %arg1: i32) -> (i32, i32) {
    %c0_i32 = arith.constant 0 : i32
    %c0_i32_0 = arith.constant 0 : i32
    return %c0_i32, %arg1 : i32, i32
  }
  func.func @transform_2(%arg0: i32, %arg1: i32) -> (i32, i32) {
    %c0_i32 = arith.constant 0 : i32
    %c0_i32_0 = arith.constant 0 : i32
    return %arg1, %c0_i32 : i32, i32
  }
  func.func @transform_3(%arg0: i32, %arg1: i32) -> (i32, i32) {
    %c0_i32 = arith.constant 0 : i32
    %c0_i32_0 = arith.constant 0 : i32
    %c0_i32_1 = arith.constant 0 : i32
    return %c0_i32, %c0_i32_0 : i32, i32
  }
  func.func @transform_4(%arg0: i32, %arg1: i32) -> (i32, i32) {
    %c0_i32 = arith.constant 0 : i32
    %c0_i32_0 = arith.constant 0 : i32
    %c0_i32_1 = arith.constant 0 : i32
    return %c0_i32, %c0_i32_0 : i32, i32
  }
  func.func @transform_5(%arg0: i32, %arg1: i32) -> (i32, i32) {
    %c0_i32 = arith.constant 0 : i32
    %c0_i32_0 = arith.constant 0 : i32
    %c0_i32_1 = arith.constant 0 : i32
    return %c0_i32, %c0_i32_0 : i32, i32
  }
  func.func @transform_6(%arg0: i32, %arg1: i32) -> (i32, i32) {
    %c0_i32 = arith.constant 0 : i32
    %c0_i32_0 = arith.constant 0 : i32
    %c0_i32_1 = arith.constant 0 : i32
    return %c0_i32, %c0_i32_0 : i32, i32
  }
  func.func @transform_7(%arg0: i32, %arg1: i32) -> (i32, i32) {
    %c0_i32 = arith.constant 0 : i32
    %c0_i32_0 = arith.constant 0 : i32
    %c0_i32_1 = arith.constant 0 : i32
    return %c0_i32, %c0_i32_0 : i32, i32
  }
  func.func @transform_8(%arg0: i32, %arg1: i32) -> (i32, i32) {
    %c0_i32 = arith.constant 0 : i32
    %c0_i32_0 = arith.constant 0 : i32
    %c0_i32_1 = arith.constant 0 : i32
    return %c0_i32, %c0_i32_0 : i32, i32
  }
  func.func @transform_9(%arg0: i32, %arg1: i32) -> (i32, i32) {
    %c0_i32 = arith.constant 0 : i32
    %c0_i32_0 = arith.constant 0 : i32
    return %arg0, %c0_i32 : i32, i32
  }
}

</mosaic_0001>

<bundles_post_ra>
// kernel: tpu_custom_call.1
= control target key start
LH: loop header
LB: loop body
LE: loop exit
PB: predicated region body
PF: predicated region fallthrough
CT: control target
= control target key end

     0   :  { %s1716_s0 = inlined_call_operand.hbm [shape: f32[16,256], index: 0, kind: input, shape index: {}]   ;;  %s1717_s1 = inlined_call_operand.vmem [shape: f32[1,256], index: 1, kind: input, shape index: {}]   ;;  %s1718_s2 = inlined_call_operand.hbm [shape: bf16[256,128], index: 2, kind: input, shape index: {}]   ;;  %s1719_s3 = inlined_call_operand.vmem [shape: f32[1,128], index: 3, kind: input, shape index: {}]   ;;  %s1720_s4 = inlined_call_operand.vmem [shape: f32[1,128], index: 4, kind: input, shape index: {}]   ;;  %s1721_s5 = inlined_call_operand.vmem [shape: bf16[128,128], index: 5, kind: input, shape index: {}]   ;;  %s1722_s6 = inlined_call_operand.vmem [shape: f32[1,128], index: 6, kind: input, shape index: {}]   ;;  %s1723_s7 = inlined_call_operand.vmem [shape: bf16[128,10], index: 7, kind: input, shape index: {}]   ;;  %s1724_s8 = inlined_call_operand.vmem [shape: f32[1,10], index: 8, kind: input, shape index: {}]   ;;  %s1725_s9 = inlined_call_operand.hbm [shape: f32[16,10], index: 9, kind: output, shape index: {}]  }
   0x1   :  { %1733 = sst [smem:[#allocation15_spill]] %s1718_s2 }
   0x2   :  { %14 = vsyncpa [#allocation4], 0 }
   0x3   :  { %16 = vsyncpa [#allocation4 + $0x1], 0 }
   0x4   :  { %17 = vsyncpa [#allocation7], 0 }
   0x5   :  { %18 = vsyncpa [#allocation5], 0 }
   0x6   :  { %20 = vsyncpa [#allocation5 + $0x1], 0  ;;  %s1416_s30 = smov 0   ;;  %s1418_s10 = smov 0  }
   0x7   :  { %s1420_s11 = smov 0   ;;  %s1422_s12 = smov 0  }
   0x8   :  { %s1424_s13 = smov 0   ;;  %s1426_s14 = smov 0  }
   0x9 LB: > { %1734 = sst [smem:[#allocation12_spill]] %s1337_s30  ;;  %s970_s15 = sadd.s32 4294967295, %s1357_s14   ;;  %s1357_s14 = sphi %s1426_s14, %s26_s14   ;;  %s1353_s13 = sphi %s1424_s13, %s1760_s13   ;;  %s1349_s12 = sphi %s1422_s12, %s1759_s12   ;;  %s1345_s11 = sphi %s1420_s11, %s1758_s11   ;;  %s1341_s10 = sphi %s1418_s10, %s1757_s10   ;;  %s1337_s30 = sphi %s1416_s30, %s1756_s30  }
   0xa   : > { %s971_s16 = sadd.s32 4294967294, %s1357_s14   ;;  %p60_p0 = scmp.ne.s32.totalorder %s1341_s10, %s1337_s30 }
   0xb   : > { %p1450_p1 = scmp.eq.s32.totalorder %s970_s15, 0  ;;  %p1454_p2 = scmp.eq.s32.totalorder %s970_s15, 1 }
   0xc   : > { %p268_p3 = scmp.eq.s32.totalorder %s971_s16, 1  ;;  %p972_p5 = scmp.ge.s32.totalorder %s1357_s14, 1 }
   0xd   : > { %s1735_s17 = scalar_select %p1450_p1, 1, 0 }
   0xe   : > { %s1736_s18 = scalar_select %p1454_p2, 1, 0 }
   0xf   : > { %p1460_p4 = por %p1450_p1, %p60_p0  ;;  %p1465_p6 = por %p268_p3, %p60_p0 }
  0x10   : > { %p275_p7 = scmp.lt.s32.totalorder %s1357_s14, 3  ;;  %s1359_s22 = smov [#allocation6]  }
  0x11   : > { %s1737_s19 = scalar_select %p1460_p4, 1, 0 }
  0x12   : > { %s1738_s20 = scalar_select %p1465_p6, 1, 0 }
  0x13   : > { %p1470_p8 = pnand %p972_p5, %p275_p7  ;;  %s298_s23 = sshll.u32 %s1359_s22, 4  ;;  %s299_s23 = int_to_ptr.vmem [resolvable:$true] %s298_s23 }
  0x14   : > { %1739 = sst [smem:[#allocation13_spill]] %s1738_s20  ;;  %s38_s25 = sadd.s32 1, %s1353_s13 }
  0x15   : > { %s1740_s21 = scalar_select %p1470_p8, 1, 0 }
  0x16   : > { %p1112_p9 = pneg %p1470_p8  ;;  %s1742_s2 = sld [smem:[#allocation15_spill]] }
  0x18   : > { %p1479_p11 = pnand %p1112_p9, %p1450_p1 }
  0x1a   : > { %p1215_p13 = pneg %p1479_p11 }
  0x1c   : > { %s1213_s28 = scalar_lea.hbm %s1742_s2, 2048 }
  0x1d   : > { %p1214_p12 = scmp.ne.s32.totalorder %s1742_s2, %s1213_s28  ;;  %p1220_p5 = scmp.lt.u32.totalorder %s1213_s28, %s1742_s2 }
  0x1f   : > { %p1216_p0 = pnand %p1215_p13, %p1214_p12 }
  0x21   : > { %p1217_p3 = pneg %p1216_p0 }
  0x23   : > { %p1222_p7 = pnand %p1220_p5, %p1217_p3 }
  0x25   : > { %1225 = shalt.err (!%p1222_p7)
}
  0x26   : > { %s1226_s20 = scalar_lea.vmem %s299_s23, 2048  ;;  %p1234_p1 = scmp.lt.s32.totalorder %s299_s23, %s299_s23 }
  0x27   : > { %p1227_p9 = scmp.ne.s32.totalorder %s299_s23, %s1226_s20  ;;  %p1235_p4 = scmp.lt.s32.totalorder %s1226_s20, %s1226_s20 }
  0x29   : > { %p1229_p10 = pnand %p1227_p9, %p1215_p13  ;;  %p1236_p8 = por %p1235_p4, %p1234_p1 }
  0x2b   : > { %p1230_p6 = pneg %p1229_p10 }
  0x2d   : > { %p1237_p2 = pnand %p1236_p8, %p1230_p6 }
  0x2f   : > { %1240 = shalt.err (!%p1237_p2)
}
  0x30   : > { %s1360_s26 = smov 64   ;;  %s1361_s27 = smov 4  }
  0x31   : > { %1115 = dma.hbm_to_vmem [thread:$0]  (!%p1479_p11), %s1742_s2, 2048, %s299_s23, [#allocation7], %s1360_s26, %s1360_s26, %s1361_s27  }
  0x32   : > { %p40_p1 = scmp.ge.s32.totalorder %s38_s25, 2  ;;  %s47_s20 = sadd.s32 1, %s1345_s11 }
  0x33   : > { %p54_p2 = scmp.ne.s32.totalorder %s1345_s11, %s1341_s10  ;;  %p55_p4 = scmp.eq.s32.totalorder %s1357_s14, 0 }
  0x34   : > { %s1762_s25 = smov (%p40_p1, %s38_s25), 0  ;;  %p1745_p8 = scmp.ne.s32.totalorder %s1736_s18, 0 }
  0x35   : > { %1743 = sst [smem:[#allocation14_spill]] %s1762_s25  ;;  %p1506_p6 = por %p55_p4, %p54_p2 }
  0x36   : > { %p1512_p10 = por %p1745_p8, %p54_p2  ;;  %s42_s24 = ssub.s32 %s1353_s13, %s1762_s25 }
  0x37   : > { %p1125_p12 = scmp.lt.s32.totalorder %s1357_s14, 2  ;;  %p45_p11 = scmp.eq.s32.totalorder %s42_s24, 0 }
  0x38   : > { %s330_s23 = sand.u32 1, %s1345_s11   ;;  %s1023_s27 = sshll.u32 %s1353_s13, 8 }
  0x39   : > { %s976_s22 = sshll.u32 %s330_s23, 4  ;;  %s1527_s2 = scalar_lea.hbm %s1716_s0, %s1023_s27 }
  0x3a   : > { %s1521_s26 = scalar_select %p45_p11, %s1345_s11, %s47_s20  }
  0x3b   : > { %s334_s18 = scalar_lea.vmem [#allocation3], %s976_s22  ;;  %p1533_p13 = pnand %p1125_p12, %p1506_p6 }
  0x3c   : > { %s344_s30 = sshll.u32 %s334_s18, 4  ;;  %s331_s20 = scalar_lea.sflag [#allocation4], %s330_s23  ;;  %s1529_s30 = int_to_ptr.vmem [resolvable:$true] %s344_s30 }
  0x3d   : > { %s1241_s25 = scalar_lea.hbm %s1527_s2, 256  ;;  %p1243_p3 = pneg %p1533_p13 }
  0x3e   : > { %p1242_p0 = scmp.ne.s32.totalorder %s1527_s2, %s1241_s25  ;;  %s1246_s28 = scalar_lea.hbm %s1716_s0, 512 }
  0x3f   : > { %p1247_p9 = scmp.lt.u32.totalorder %s1527_s2, %s1716_s0  ;;  %p1248_p1 = scmp.lt.u32.totalorder %s1246_s28, %s1241_s25 }
  0x40   : > { %p1244_p5 = pnand %p1243_p3, %p1242_p0  ;;  %p1250_p4 = scmp.lt.u32.totalorder %s1241_s25, %s1527_s2 }
  0x41   : > { %p1249_p2 = por %p1248_p1, %p1247_p9 }
  0x42   : > { %p1245_p7 = pneg %p1244_p5 }
  0x43   : > { %p1251_p6 = por %p1250_p4, %p1249_p2 }
  0x45   : > { %p1252_p8 = pnand %p1251_p6, %p1245_p7 }
  0x47   : > { %1255 = shalt.err (!%p1252_p8)
}
  0x48   : > { %s1256_s23 = scalar_lea.vmem %s1529_s30, 256  ;;  %s1362_s18 = smov [#allocation3]  }
  0x49   : > { %p1257_p12 = scmp.ne.s32.totalorder %s1529_s30, %s1256_s23  ;;  %s1261_s22 = sshll.u32 %s1362_s18, 4  ;;  %s1262_s22 = int_to_ptr.vmem [resolvable:$false] %s1261_s22 }
  0x4a   : > { %s1263_s27 = scalar_lea.vmem %s1262_s22, 512  ;;  %p1264_p5 = scmp.lt.s32.totalorder %s1529_s30, %s1262_s22 }
  0x4b   : > { %p1259_p11 = pnand %p1257_p12, %p1243_p3  ;;  %p1265_p9 = scmp.lt.s32.totalorder %s1263_s27, %s1256_s23 }
  0x4d   : > { %p1260_p0 = pneg %p1259_p11  ;;  %p1266_p1 = por %p1265_p9, %p1264_p5 }
  0x4f   : > { %p1267_p2 = pnand %p1266_p1, %p1260_p0 }
  0x51   : > { %1270 = shalt.err (!%p1267_p2)
}
  0x52   : > { %1119 = dma.hbm_to_vmem [thread:$0]  (!%p1533_p13), %s1527_s2, 256, %s1529_s30, %s331_s20  }
  0x53   : > { %p1748_p7 = scmp.ne.s32.totalorder %s1740_s21, 0 }
  0x54   : > { %s1565_s25 = sand.u32 (!%p1748_p7), 1, %s1341_s10   ;;  %p1749_p3 = scmp.ne.s32.totalorder (!%p1748_p7), %s1737_s19, 0 }
  0x55   : > { %353 = sbr.rel (%p1748_p7) target bundleno = 796 (0x31c), region = 56  ;;  %s980_s28 = sshll.u32 (!%p1748_p7), %s1565_s25, 4 }
  0x56   : > { %s356_s15 = scalar_lea.sflag (!%p1748_p7), [#allocation4], %s1565_s25  ;;  %s1569_s29 = scalar_lea.vmem (!%p1748_p7), [#allocation3], %s980_s28 }
  0x5c   : > { %1324 = dma.done.wait (%p1749_p3), %s356_s15, 256  }
  0x5d   : > { %1326 = vsyncadd (%p1749_p3), %s356_s15, 4294967040  ;;  %p1750_p13 = scmp.ne.s32.totalorder %s1735_s17, 0 }
  0x5f   : > { %1328 = dma.done.wait (%p1750_p13), [#allocation7], 2048  }
  0x60   : > { %1330 = vsyncadd (%p1750_p13), [#allocation7], 4294965248  ;;  %v1363_v0 = vmov 0.0   ;;  %v1181_v1 = vld [vmem:[#allocation6 + $0x40] sm:$0xff]   ;;  %v1183_v3 = vld [vmem:[#allocation6 + $0x48] sm:$0xff]   ;;  %v419_v6 = vlaneseq  ;;  %vm1364_vm0 = vmmov 0  }
  0x61   : > { %1064 = vmatprep.subr.bf16.mxu1 %v1363_v0  ;;  %v1182_v2 = vld [vmem:[#allocation6] sm:$0xff]   ;;  %1024 = vmatprep.subr.bf16.mxu0 %v1181_v1  ;;  %v1184_v4 = vld [vmem:[#allocation6 + $0x8] sm:$0xff]   ;;  %v1185_v5 = vld [vmem:[#allocation6 + $0x50] sm:$0xff]   ;;  %s982_s15 = sshll.u32 %s1565_s25, 3  ;;  %s1020_s30 = sshll.u32 %s1349_s12, 7  ;;  %vm849_vm1 = vcmask 80896  }
  0x62   : > { %1025 = vmatpush3.bf16.msra.mxu0 %v1182_v2  ;;  %v1186_v7 = vld [vmem:[#allocation6 + $0x10] sm:$0xff]   ;;  %v1187_v8 = vld [vmem:[#allocation6 + $0x58] sm:$0xff]   ;;  %v420_v9 = vshrl.u32 %v419_v6, 7  ;;  %v1189_v11 = vld [vmem:[#allocation6 + $0x60] sm:$0xff]   ;;  %1080 = vmatprep.mubr.msk.bf16.mxu1 %vm1364_vm0, %v1363_v0  ;;  %s401_s17 = scalar_lea.vmem [#allocation8], %s982_s15  ;;  %s1667_s20 = scalar_lea.hbm %s1725_s9, %s1020_s30 }
  0x63   : > { %1026 = vmatprep.subr.bf16.mxu0 %v1183_v3  ;;  %v1188_v10 = vld [vmem:[#allocation6 + $0x18] sm:$0xff]   ;;  %v1190_v13 = vld [vmem:[#allocation6 + $0x20] sm:$0xff]   ;;  %v1191_v14 = vld [vmem:[#allocation6 + $0x68] sm:$0xff]   ;;  %s865_s19 = sshll.u32 %s401_s17, 4  ;;  %s852_s12 = scalar_lea.sflag [#allocation5], %s1565_s25  ;;  %s1669_s19 = int_to_ptr.vmem [resolvable:$true] %s865_s19 }
  0x64   : > { %v425_v12 = vsub.s32 1, %v420_v9  ;;  %v416_v15 = vld [vmem:[%s1569_s29 + $0x8] sm:$0xff]  ;;  %v417_v16 = vld [vmem:[%s1717_s1] sm:$0x3]  ;;  %v421_v20 = vsub.s32 0, %v420_v9  ;;  %v1193_v21 = vld [vmem:[#allocation6 + $0x70] sm:$0xff]  }
  0x65   : > { %v1197_v18 = vld [vmem:[%s1721_s5] sm:$0xff]   ;;  %v1192_v19 = vld [vmem:[#allocation6 + $0x28] sm:$0xff]   ;;  %v1194_v24 = vld [vmem:[#allocation6 + $0x30] sm:$0xff]   ;;  %s1271_s23 = scalar_lea.vmem %s1669_s19, 128  ;;  %s1365_s18 = smov [#allocation8]  }
  0x66   : > { %1027 = vmatpush3.bf16.msra.mxu0 %v1184_v4  ;;  %v426_v17 = vrot.slane %v417_v16, %v425_v12  ;;  %1065 = vmatpush3.bf16.msra.mxu1 %v1197_v18  ;;  %v1198_v23 = vld [vmem:[%s1721_s5 + $0x8] sm:$0xff]   ;;  %v415_v26 = vld [vmem:[%s1569_s29] sm:$0xff]  ;;  %v1195_v27 = vld [vmem:[#allocation6 + $0x78] sm:$0xff]   ;;  %v422_v28 = vrot.slane %v417_v16, %v421_v20  ;;  %p1272_p4 = scmp.ne.s32.totalorder %s1669_s19, %s1271_s23  ;;  %s1275_s22 = sshll.u32 %s1365_s18, 4  ;;  %s1276_s22 = int_to_ptr.vmem [resolvable:$false] %s1275_s22 }
  0x67   : > { %1028 = vmatprep.subr.bf16.mxu0 %v1185_v5  ;;  %1066 = vmatprep.subr.bf16.mxu1 %v1363_v0  ;;  %v1199_v29 = vld [vmem:[%s1721_s5 + $0x10] sm:$0xff]   ;;  %v1196_v30 = vld [vmem:[#allocation6 + $0x38] sm:$0xff]   ;;  %v1201_v34 = vld [vmem:[%s1721_s5 + $0x20] sm:$0xff]   ;;  %s1277_s27 = scalar_lea.vmem %s1276_s22, 256  ;;  %p1278_p12 = scmp.lt.s32.totalorder %s1669_s19, %s1276_s22 }
  0x68   : > { %v430_v22 = vsub.f32 %v416_v15, %v426_v17  ;;  %v429_v31 = vsub.f32 %v415_v26, %v422_v28  ;;  %v1200_v32 = vld [vmem:[%s1721_s5 + $0x18] sm:$0xff]   ;;  %v1202_v35 = vld [vmem:[%s1721_s5 + $0x28] sm:$0xff]   ;;  %v1203_v36 = vld [vmem:[%s1721_s5 + $0x30] sm:$0xff]   ;;  %p1273_p6 = pnand %p1272_p4, %p1512_p10  ;;  %p1279_p11 = scmp.lt.s32.totalorder %s1277_s27, %s1271_s23 }
  0x69   : > { %v1204_v37 = vld [vmem:[%s1721_s5 + $0x38] sm:$0xff]   ;;  %v1205_v38 = vld [vmem:[%s1723_s7] sm:$0xff]   ;;  %v1206_v39 = vld [vmem:[%s1723_s7 + $0x8] sm:$0xff]  }
  0x6a   : > { %1029 = vmatpush3.bf16.msra.mxu0 %v1186_v7  ;;  %v432_v25 = vpack.c.bf16 %v430_v22, %v430_v22  ;;  %1067 = vmatpush3.bf16.msra.mxu1 %v1198_v23  ;;  %v431_v33 = vpack.c.bf16 %v429_v31, %v429_v31  ;;  %v1207_v40 = vld [vmem:[%s1723_s7 + $0x10] sm:$0xff]   ;;  %v1208_v41 = vld [vmem:[%s1723_s7 + $0x18] sm:$0xff]   ;;  %v1209_v42 = vld [vmem:[%s1723_s7 + $0x20] sm:$0xff]   ;;  %p1274_p8 = pneg %p1273_p6  ;;  %p1280_p0 = por %p1279_p11, %p1278_p12 }
  0x6b   : > { %1030 = vmatprep.subr.bf16.mxu0 %v1187_v8  ;;  %1068 = vmatprep.subr.bf16.mxu1 %v1363_v0  ;;  %v1210_v43 = vld [vmem:[%s1723_s7 + $0x28] sm:$0xff]   ;;  %v999_v46 = vld [vmem:[%s1719_s3] ss:$0 sm:$0xff]  ;;  %v1211_v54 = vld [vmem:[%s1723_s7 + $0x30] sm:$0xff]  }
  0x6c   : > { %594 = vmatprep.mubr.bf16.mxu0 %v432_v25  ;;  %v1000_v50 = vld [vmem:[%s1720_s4] ss:$0 sm:$0xff]  ;;  %v1212_v55 = vld [vmem:[%s1723_s7 + $0x38] sm:$0xff]   ;;  %p1281_p5 = pnand %p1280_p0, %p1274_p8 }
  0x6d   : > { %v1001_v56 = vld [vmem:[%s1722_s6] ss:$0 sm:$0xff] }
  0x6e   : > { %1031 = vmatpush3.bf16.msra.mxu0 %v1188_v10  ;;  %1069 = vmatpush3.bf16.msra.mxu1 %v1199_v29 }
  0x6f   : > { %1032 = vmatprep.subr.bf16.mxu0 %v1189_v11  ;;  %1070 = vmatprep.subr.bf16.mxu1 %v1363_v0 }
  0x72   : > { %1033 = vmatpush3.bf16.msra.mxu0 %v1190_v13  ;;  %1071 = vmatpush3.bf16.msra.mxu1 %v1200_v32 }
  0x73   : > { %1034 = vmatprep.subr.bf16.mxu0 %v1191_v14  ;;  %1072 = vmatprep.subr.bf16.mxu1 %v1363_v0 }
  0x76   : > { %1035 = vmatpush3.bf16.msra.mxu0 %v1192_v19  ;;  %1073 = vmatpush3.bf16.msra.mxu1 %v1201_v34 }
  0x77   : > { %1036 = vmatprep.subr.bf16.mxu0 %v1193_v21  ;;  %1074 = vmatprep.subr.bf16.mxu1 %v1363_v0 }
  0x7a   : > { %1037 = vmatpush3.bf16.msra.mxu0 %v1194_v24  ;;  %1075 = vmatpush3.bf16.msra.mxu1 %v1202_v35 }
  0x7b   : > { %1038 = vmatprep.subr.bf16.mxu0 %v1195_v27  ;;  %1076 = vmatprep.subr.bf16.mxu1 %v1363_v0 }
  0x7e   : > { %1039 = vmatpush3.bf16.msra.mxu0 %v1196_v30  ;;  %1077 = vmatpush3.bf16.msra.mxu1 %v1203_v36 }
  0x7f   : > { %1084 = vmatprep.subr.bf16.mxu0 %v1363_v0  ;;  %1078 = vmatprep.subr.bf16.mxu1 %v1363_v0 }
  0x81   : > { %595 = vmatmul.mubr.bf16.vlgmr.msra.gmra.mrb[0].mxu0 %v431_v33 }
  0x82   : > { %1100 = vmatprep.mubr.msk.bf16.mxu0 %vm1364_vm0, %v1363_v0  ;;  %1079 = vmatpush3.bf16.msra.mxu1 %v1204_v37 }
  0x83   : > { %1085 = vmatpush3.bf16.msra.mxu0 %v1205_v38 }
  0x84   : > { %1086 = vmatprep.subr.bf16.mxu0 %v1363_v0 }
  0x87   : > { %1087 = vmatpush3.bf16.msra.mxu0 %v1206_v39 }
  0x88   : > { %1088 = vmatprep.subr.bf16.mxu0 %v1363_v0 }
  0x8b   : > { %1089 = vmatpush3.bf16.msra.mxu0 %v1207_v40 }
  0x8c   : > { %1090 = vmatprep.subr.bf16.mxu0 %v1363_v0 }
  0x8f   : > { %1091 = vmatpush3.bf16.msra.mxu0 %v1208_v41 }
  0x90   : > { %1092 = vmatprep.subr.bf16.mxu0 %v1363_v0 }
  0x93   : > { %1093 = vmatpush3.bf16.msra.mxu0 %v1209_v42 }
  0x94   : > { %1094 = vmatprep.subr.bf16.mxu0 %v1363_v0 }
  0x97   : > { %1095 = vmatpush3.bf16.msra.mxu0 %v1210_v43 }
  0x98   : > { %1096 = vmatprep.subr.bf16.mxu0 %v1363_v0 }
  0x9b   : > { %1097 = vmatpush3.bf16.msra.mxu0 %v1211_v54 }
  0x9c   : > { %1098 = vmatprep.subr.bf16.mxu0 %v1363_v0  ;;  %v1010_v0 = vld [vmem:[%s1724_s8] ss:$0 sm:$0xff] }
  0x9f   : > { %1099 = vmatpush3.bf16.msra.mxu0 %v1212_v55 }
 0x154   : > { %v1040_v44 = vpop.f32.mrb[0].mxu0 }
 0x155   : > { %v1041_v45 = vpop.f32.mrb[1].mxu0 }
 0x156   : > { %v1042_v47 = vadd.f32 %v1041_v45, %v1040_v44  ;;  %v1043_v48 = vpop.f32.mrb[2].mxu0 }
 0x157   : > { %v1044_v49 = vpop.f32.mrb[3].mxu0 }
 0x158   : > { %v615_v51 = vsub.f32 %v1042_v47, %v999_v46 }
 0x15a   : > { %v623_v52 = vmul.f32 %v1000_v50, %v615_v51 }
 0x15c   : > { %v624_v53 = vpack.c.bf16 %v623_v52, %v623_v52 }
 0x15e   : > { %1081 = vmatmul.mubr.bf16.vlgmr.msra.gmra.mrb[0].mxu1 %v624_v53 }
 0x231   : > { %v730_v57 = vpop.f32.mrb[0].mxu1 }
 0x232   : > { %v731_v58 = vadd.f32 %v1001_v56, %v730_v57  ;;  %v1082_v59 = vpop.f32.mrb[1].mxu1 }
 0x233   : > { %v733_v60 = vpop.f32.mrb[2].mxu1 }
 0x234   : > { %v736_v61 = vmax.f32 %v731_v58, 0.0  ;;  %v1083_v62 = vpop.f32.mrb[3].mxu1 }
 0x236   : > { %v737_v63 = vpack.c.bf16 %v736_v61, %v736_v61 }
 0x238   : > { %1101 = vmatmul.mubr.bf16.vlgmr.msra.gmra.mrb[4].mxu0 %v737_v63 }
 0x30b   : > { %v843_v1 = vpop.f32.mrb[4].mxu0 }
 0x30c   : > { %v844_v2 = vadd.f32 %v1010_v0, %v843_v1  ;;  %v1102_v3 = vpop.f32.mrb[5].mxu0 }
 0x30d   : > { %v846_v4 = vpop.f32.mrb[6].mxu0 }
 0x30e   : > { %v1103_v5 = vpop.f32.mrb[7].mxu0  ;;  %850 = vst.msk [vmem:[%s401_s17] sm:$0xff] %vm849_vm1, %v844_v2 }
 0x30f   : > { %1284 = shalt.err (!%p1281_p5)
}
 0x310   : > { %s1285_s25 = scalar_lea.hbm %s1667_s20, 128  ;;  %s1289_s29 = scalar_lea.hbm %s1725_s9, 256 }
 0x311   : > { %p1286_p9 = scmp.ne.s32.totalorder %s1667_s20, %s1285_s25  ;;  %p1290_p7 = scmp.lt.u32.totalorder %s1667_s20, %s1725_s9 }
 0x312   : > { %p1291_p3 = scmp.lt.u32.totalorder %s1289_s29, %s1285_s25  ;;  %p1293_p4 = scmp.lt.u32.totalorder %s1285_s25, %s1667_s20 }
 0x313   : > { %p1287_p1 = pnand %p1286_p9, %p1512_p10 }
 0x314   : > { %p1292_p13 = por %p1291_p3, %p1290_p7 }
 0x315   : > { %p1288_p2 = pneg %p1287_p1 }
 0x316   : > { %p1294_p6 = por %p1293_p4, %p1292_p13 }
 0x318   : > { %p1295_p8 = pnand %p1294_p6, %p1288_p2 }
 0x31a   : > { %1298 = shalt.err (!%p1295_p8)
}
 0x31b   : > { %1110 = dma.vmem_to_hbm [thread:$0]  (%p1512_p10), %s1669_s19, 128, %s1667_s20, %s852_s12  }
 0x31c PF: > { %s1751_s17 = sld [smem:[#allocation12_spill]]  ;;  %s1752_s21 = sld [smem:[#allocation13_spill]] }
 0x31d   : > { %p1754_p11 = scmp.ge.s32.totalorder %s1357_s14, 2 }
 0x322   : > { %s877_s24 = sand.u32 1, %s1751_s17   ;;  %p1753_p12 = scmp.ne.s32.totalorder %s1752_s21, 0 }
 0x323   : > { %s878_s23 = scalar_lea.sflag [#allocation5], %s877_s24 }
 0x324   : > { %p1121_p0 = pnand %p1754_p11, %p1753_p12 }
 0x326   : > { %1332 = dma.done.wait (!%p1121_p0), %s878_s23, 128  }
 0x327   : > { %1334 = vsyncadd (!%p1121_p0), %s878_s23, 4294967168  ;;  %s26_s14 = sadd.s32 1, %s1357_s14   ;;  %s1755_s16 = sld [smem:[#allocation14_spill]] }
 0x328   : > { %p23_p5 = scmp.ge.s32.totalorder %s26_s14, 4   ;;  %s1756_s30 = smov %s1341_s10 }
 0x329   : > { %s1757_s10 = smov %s1345_s11  ;;  %s1758_s11 = smov %s1521_s26 }
 0x32a   : > { %s1759_s12 = smov %s1353_s13  ;;  %25 = sbr.rel (!%p23_p5) target bundleno = 9 (0x9), region = 117 }
 0x32d   : > { %s1760_s13 = smov %s1755_s16 }
 0x331   :  { %883 = vsyncpa [#allocation4], 1 }
 0x332   :  { %885 = vsyncpa [#allocation4 + $0x1], 1 }
 0x333   :  { %886 = vsyncpa [#allocation7], 1 }
 0x334   :  { %887 = vsyncpa [#allocation5], 1 }
 0x335   :  { %889 = vsyncpa [#allocation5 + $0x1], 1 }

</bundles_post_ra>
